<compile_context>
chip_gen: v7x
topology: tpu7x:2x2x1
jax: 0.10.0
libtpu: 0.0.40
codegen_flags: <defaults>
</compile_context>

<pallas_src>
import functools

import jax
import jax.numpy as jnp
from jax.experimental import pallas as pl
from jax.experimental.pallas import tpu as pltpu


def _ce_label_smooth_kernel(
    x_ref, t_ref, o_ref, acc_ref, *, coef_target, coef_uniform, inv_n,
    num_classes, n_total, tile_n, tiles_per_shard,
):
    # x_ref: (TILE_N, C) logits tile (native dtype)
    # t_ref: (TILE_N, 1) int32 labels tile
    # o_ref: (1, 1, 1) f32 per-shard partial loss (written once per shard)
    # acc_ref: (1, 1) f32 VMEM scratch (resident per-shard accumulator)
    shard = pl.program_id(0)
    t = pl.program_id(1)

    @pl.when(t == 0)
    def _():
        acc_ref[...] = jnp.zeros_like(acc_ref)

    # Pass 1: row max (inline f32 cast; no stored f32 tile).
    m = jnp.max(x_ref[...].astype(jnp.float32), axis=1, keepdims=True)  # (TN,1)

    # Pass 2: exp-sum for the logsumexp (EUP exp, VALU add).
    sum_exp = jnp.sum(
        jnp.exp(x_ref[...].astype(jnp.float32) - m), axis=1, keepdims=True
    )                                                                   # (TN,1)
    lse = jnp.log(sum_exp)                                              # (TN,1)

    # Pass 3: weighted row sum of shifted logits; weights fold label smoothing.
    labels = t_ref[...]                                                 # (TN,1)
    col_ids = jax.lax.broadcasted_iota(jnp.int32, (tile_n, num_classes), 1)
    w = jnp.where(col_ids == labels, coef_uniform + coef_target, coef_uniform)
    wsum = jnp.sum(
        (x_ref[...].astype(jnp.float32) - m) * w, axis=1, keepdims=True
    )                                                                   # (TN,1)

    # Per-row contribution:
    #   coef_t*lp[i,y_i] + coef_u*sum_j lp[i,j]
    # = sum_j (x_ij - m_i)*w_ij + lse_i/N     (since coef_t + C*coef_u = -1/N)
    row_loss = wsum + inv_n * lse                                       # (TN,1)

    # Mask rows past the true batch size (tile tail / fully padded shard tile).
    # Keep the SELECT form: padded rows may contain garbage (even NaN).
    tile_idx = shard * tiles_per_shard + t
    row_ids = (
        jax.lax.broadcasted_iota(jnp.int32, (tile_n, 1), 0) + tile_idx * tile_n
    )
    row_loss = jnp.where(row_ids < n_total, row_loss, 0.0)

    acc_ref[...] += jnp.sum(row_loss, axis=(0, 1), keepdims=True)

    @pl.when(t == pl.num_programs(1) - 1)
    def _():
        o_ref[...] = acc_ref[...].reshape(1, 1, 1)


def cross_entropy_label_smooth(inputs, targets, *, epsilon, tile_n=None):
    """inputs: (N, C) float logits; targets: (N,) int labels. Returns scalar f32."""
    N, C = inputs.shape
    targets2d = targets.reshape(N, 1).astype(jnp.int32)
    itemsize = inputs.dtype.itemsize

    # Per-row VMEM cost of one tile step:
    #   2x double-buffered native logits row + 2x lane-padded (128) int32 label
    #   row + ~2 full-row f32 temporaries (exp pass / weight pass).
    per_row_bytes = 2 * C * itemsize + 2 * 128 * 4 + 2 * C * 4

    if tile_n is None:
        # ~36 MiB of tile buffers: fits v7x's 64 MiB/TC VMEM with headroom and
        # is far below v5e/v6e physical VMEM (128 MiB).  No artificial row cap.
        budget = 36 * 1024 * 1024
        tile_n = max(8, budget // max(per_row_bytes, 1))
    if tile_n >= N:
        tile_n = N                          # block == full dim is always legal
    else:
        tile_n = max(8, (tile_n // 8) * 8)  # sublane-aligned

    num_tiles = pl.cdiv(N, tile_n)
    # Leading "parallel" grid axis: lets v7x's 2 TensorCores split the batch.
    num_shards = 2 if num_tiles >= 2 else 1
    tiles_per_shard = pl.cdiv(num_tiles, num_shards)

    # Fold all scalar constants (label-smoothing weights and 1/N) at trace time.
    eps = float(epsilon)
    coef_target = -(1.0 - eps) / float(N)
    coef_uniform = -(eps / float(C)) / float(N)
    inv_n = 1.0 / float(N)

    kernel = functools.partial(
        _ce_label_smooth_kernel,
        coef_target=coef_target,
        coef_uniform=coef_uniform,
        inv_n=inv_n,
        num_classes=C,
        n_total=N,
        tile_n=tile_n,
        tiles_per_shard=tiles_per_shard,
    )

    # Shard tiles may run past the real tile count; clamp the block index (the
    # kernel masks those rows away via the unclamped tile index).
    def _row_block(s, t):
        return (jnp.minimum(s * tiles_per_shard + t, num_tiles - 1), 0)

    # Explicit scoped-VMEM limit sized to the actual need (v5e default is only
    # 16 MiB); capped at 48 MiB so it always fits v7x's 64 MiB physical VMEM.
    vmem_need = tile_n * per_row_bytes + (4 << 20)
    vmem_limit = int(min(48 << 20, max(16 << 20, vmem_need)))

    out = pl.pallas_call(
        kernel,
        out_shape=jax.ShapeDtypeStruct((num_shards, 1, 1), jnp.float32),
        grid_spec=pltpu.PrefetchScalarGridSpec(
            num_scalar_prefetch=0,
            grid=(num_shards, tiles_per_shard),
            in_specs=[
                pl.BlockSpec((tile_n, C), _row_block),
                pl.BlockSpec((tile_n, 1), _row_block),
            ],
            out_specs=pl.BlockSpec((1, 1, 1), lambda s, t: (s, 0, 0)),
            scratch_shapes=[pltpu.VMEM((1, 1), jnp.float32)],
        ),
        compiler_params=pltpu.CompilerParams(
            dimension_semantics=("parallel", "arbitrary"),
            vmem_limit_bytes=vmem_limit,
        ),
    )(inputs, targets2d)

    # Combine the (<= 2) per-shard partial sums into the scalar loss.
    return jnp.sum(out)


def _reference(inputs, targets, epsilon):
    # pure-JAX reference mirroring the PyTorch module
    N, C = inputs.shape
    log_probs = jax.nn.log_softmax(inputs.astype(jnp.float32), axis=1)
    t = jax.nn.one_hot(targets, C, dtype=jnp.float32)
    t = (1.0 - epsilon) * t + epsilon / C
    return jnp.sum(jnp.mean(-t * log_probs, axis=0))


if __name__ == "__main__":
    key = jax.random.PRNGKey(0)
    k1, k2 = jax.random.split(key)

    # Small shapes; N deliberately not a multiple of the tile to exercise the
    # multi-tile accumulation, the 2-shard parallel axis, the clamped
    # fully-padded shard tile and the padded-row masking.
    N, C = 20, 32
    epsilon = 0.1

    logits = jax.random.normal(k1, (N, C), dtype=jnp.float32)
    labels = jax.random.randint(k2, (N,), 0, C, dtype=jnp.int32)

    ref = _reference(logits, labels, epsilon)

    # Explicit small tile: multi-step accumulation + 2-shard path.
    loss = cross_entropy_label_smooth(logits, labels, epsilon=epsilon, tile_n=8)
    loss = jax.block_until_ready(loss)
    assert jnp.allclose(loss, ref, rtol=1e-5, atol=1e-5), (loss, ref)

    # Auto tile sizing (single full-batch tile at these shapes).
    loss_auto = jax.block_until_ready(
        cross_entropy_label_smooth(logits, labels, epsilon=epsilon)
    )
    assert jnp.allclose(loss_auto, ref, rtol=1e-5, atol=1e-5), (loss_auto, ref)

    # bf16 logits path: inline f32 upcast inside each in-kernel reduction.
    logits_bf16 = logits.astype(jnp.bfloat16)
    ref_bf16 = _reference(logits_bf16, labels, epsilon)
    loss_bf16 = jax.block_until_ready(
        cross_entropy_label_smooth(logits_bf16, labels, epsilon=epsilon, tile_n=8)
    )
    assert jnp.allclose(loss_bf16, ref_bf16, rtol=1e-3, atol=1e-3), (
        loss_bf16, ref_bf16)

    print("KERNEL_OK")
</pallas_src>

<mosaic_0001>
module attributes {stable_mosaic.version = 11 : i64} {
  func.func @_ce_label_smooth_kernel(%arg0: i32, %arg1: i32, %arg2: memref<8x32xf32, #tpu.memory_space<vmem>>, %arg3: memref<8x1xi32, #tpu.memory_space<vmem>>, %arg4: memref<1x1x1xf32, #tpu.memory_space<vmem>>, %arg5: memref<1x1xf32, #tpu.memory_space<vmem>>) attributes {dimension_semantics = [#tpu.dimension_semantics<parallel>, #tpu.dimension_semantics<arbitrary>], iteration_bounds = array<i64: 2, 2>, scalar_prefetch = 0 : i64, scratch_operands = 1 : i64, tpu.core_type = #tpu.core_type<tc>, window_params = [{transform_indices = @transform_0, window_bounds = array<i64: 8, 32>}, {transform_indices = @transform_1, window_bounds = array<i64: 8, 1>}, {transform_indices = @transform_2, window_bounds = array<i64: 1, 1, 1>}]} {
    %c0_i32 = arith.constant 0 : i32
    %0 = arith.cmpi eq, %arg1, %c0_i32 : i32
    %1 = arith.extui %0 : i1 to i32
    %c0_i32_0 = arith.constant 0 : i32
    %2 = arith.cmpi ne, %1, %c0_i32_0 : i32
    scf.if %2 {
      %cst_20 = arith.constant 0.000000e+00 : f32
      %50 = vector.broadcast %cst_20 : f32 to vector<1x1xf32>
      %c0_21 = arith.constant 0 : index
      %c0_22 = arith.constant 0 : index
      %51 = vector.load %arg5[%c0_21, %c0_22] : memref<1x1xf32, #tpu.memory_space<vmem>>, vector<1x1xf32>
      tpu.vector_store %arg5[%c0_21, %c0_22], %50 {strides = array<i32>} : memref<1x1xf32, #tpu.memory_space<vmem>>, vector<1x1xf32>,
    } else {
    }
    %c0 = arith.constant 0 : index
    %c0_1 = arith.constant 0 : index
    %3 = vector.load %arg2[%c0, %c0_1] : memref<8x32xf32, #tpu.memory_space<vmem>>, vector<8x32xf32>
    %cst = arith.constant dense<0xFF800000> : vector<8xf32>
    %4 = vector.multi_reduction <maximumf>, %3, %cst [1] : vector<8x32xf32> to vector<8xf32>
    %5 = vector.shape_cast %4 : vector<8xf32> to vector<8x1xf32>
    %c0_2 = arith.constant 0 : index
    %c0_3 = arith.constant 0 : index
    %6 = vector.load %arg2[%c0_2, %c0_3] : memref<8x32xf32, #tpu.memory_space<vmem>>, vector<8x32xf32>
    %7 = vector.broadcast %5 : vector<8x1xf32> to vector<8x32xf32>
    %8 = arith.subf %6, %7 : vector<8x32xf32>
    %9 = math.exp %8 : vector<8x32xf32>
    %cst_4 = arith.constant dense<0.000000e+00> : vector<8xf32>
    %10 = vector.multi_reduction <add>, %9, %cst_4 [1] : vector<8x32xf32> to vector<8xf32>
    %11 = vector.shape_cast %10 : vector<8xf32> to vector<8x1xf32>
    %12 = math.log %11 : vector<8x1xf32>
    %c0_5 = arith.constant 0 : index
    %c0_6 = arith.constant 0 : index
    %13 = vector.load %arg3[%c0_5, %c0_6] : memref<8x1xi32, #tpu.memory_space<vmem>>, vector<8x1xi32>
    %14 = tpu.iota {dimensions = array<i32: 1>} : vector<8x32xi32>
    %15 = vector.broadcast %13 : vector<8x1xi32> to vector<8x32xi32>
    %16 = arith.cmpi eq, %14, %15 : vector<8x32xi32>
    %cst_7 = arith.constant -0.0451562516 : f32
    %cst_8 = arith.constant -1.562500e-04 : f32
    %17 = vector.broadcast %cst_7 : f32 to vector<8x32xf32>
    %18 = vector.broadcast %cst_8 : f32 to vector<8x32xf32>
    %19 = arith.select %16, %17, %18 : vector<8x32xi1>, vector<8x32xf32>
    %c0_9 = arith.constant 0 : index
    %c0_10 = arith.constant 0 : index
    %20 = vector.load %arg2[%c0_9, %c0_10] : memref<8x32xf32, #tpu.memory_space<vmem>>, vector<8x32xf32>
    %21 = vector.broadcast %5 : vector<8x1xf32> to vector<8x32xf32>
    %22 = arith.subf %20, %21 : vector<8x32xf32>
    %23 = arith.mulf %22, %19 : vector<8x32xf32>
    %cst_11 = arith.constant dense<0.000000e+00> : vector<8xf32>
    %24 = vector.multi_reduction <add>, %23, %cst_11 [1] : vector<8x32xf32> to vector<8xf32>
    %25 = vector.shape_cast %24 : vector<8xf32> to vector<8x1xf32>
    %cst_12 = arith.constant 5.000000e-02 : f32
    %26 = vector.broadcast %cst_12 : f32 to vector<8x1xf32>
    %27 = arith.mulf %26, %12 : vector<8x1xf32>
    %28 = arith.addf %25, %27 : vector<8x1xf32>
    %c2_i32 = arith.constant 2 : i32
    %29 = arith.muli %arg0, %c2_i32 : i32
    %30 = arith.addi %29, %arg1 : i32
    %31 = tpu.iota {dimensions = array<i32: 0>} : vector<8x1xi32>
    %c8_i32 = arith.constant 8 : i32
    %32 = arith.muli %30, %c8_i32 : i32
    %33 = vector.broadcast %32 : i32 to vector<8x1xi32>
    %34 = arith.addi %31, %33 : vector<8x1xi32>
    %c20_i32 = arith.constant 20 : i32
    %35 = vector.broadcast %c20_i32 : i32 to vector<8x1xi32>
    %36 = arith.cmpi slt, %34, %35 : vector<8x1xi32>
    %cst_13 = arith.constant 0.000000e+00 : f32
    %37 = vector.broadcast %cst_13 : f32 to vector<8x1xf32>
    %38 = arith.select %36, %28, %37 : vector<8x1xi1>, vector<8x1xf32>
    %c0_14 = arith.constant 0 : index
    %c0_15 = arith.constant 0 : index
    %39 = vector.load %arg5[%c0_14, %c0_15] : memref<1x1xf32, #tpu.memory_space<vmem>>, vector<1x1xf32>
    %40 = vector.shape_cast %38 : vector<8x1xf32> to vector<1x8x1xf32>
    %cst_16 = arith.constant dense<0.000000e+00> : vector<1xf32>
    %41 = vector.multi_reduction <add>, %40, %cst_16 [1, 2] : vector<1x8x1xf32> to vector<1xf32>
    %42 = vector.shape_cast %41 : vector<1xf32> to vector<1x1x1xf32>
    %43 = vector.extract %42[0, 0, 0] : f32 from vector<1x1x1xf32>
    %44 = vector.broadcast %43 : f32 to vector<1x1xf32>
    %45 = arith.addf %39, %44 : vector<1x1xf32>
    %c0_17 = arith.constant 0 : index
    %c0_18 = arith.constant 0 : index
    %46 = vector.load %arg5[%c0_17, %c0_18] : memref<1x1xf32, #tpu.memory_space<vmem>>, vector<1x1xf32>
    tpu.vector_store %arg5[%c0_17, %c0_18], %45 {strides = array<i32>} : memref<1x1xf32, #tpu.memory_space<vmem>>, vector<1x1xf32>,
    %c1_i32 = arith.constant 1 : i32
    %47 = arith.cmpi eq, %arg1, %c1_i32 : i32
    %48 = arith.extui %47 : i1 to i32
    %c0_i32_19 = arith.constant 0 : i32
    %49 = arith.cmpi ne, %48, %c0_i32_19 : i32
    scf.if %49 {
      %c0_20 = arith.constant 0 : index
      %c0_21 = arith.constant 0 : index
      %50 = vector.load %arg5[%c0_20, %c0_21] : memref<1x1xf32, #tpu.memory_space<vmem>>, vector<1x1xf32>
      %51 = vector.shape_cast %50 : vector<1x1xf32> to vector<1x1x1xf32>
      %c0_22 = arith.constant 0 : index
      %c0_23 = arith.constant 0 : index
      %c0_24 = arith.constant 0 : index
      %52 = vector.load %arg4[%c0_22, %c0_23, %c0_24] : memref<1x1x1xf32, #tpu.memory_space<vmem>>, vector<1x1x1xf32>
      tpu.vector_store %arg4[%c0_22, %c0_23, %c0_24], %51 {strides = array<i32>} : memref<1x1x1xf32, #tpu.memory_space<vmem>>, vector<1x1x1xf32>,
    } else {
    }
    return
  }
  func.func @transform_0(%arg0: i32, %arg1: i32) -> (i32, i32) {
    %c2_i32 = arith.constant 2 : i32
    %0 = arith.muli %arg0, %c2_i32 : i32
    %1 = arith.addi %0, %arg1 : i32
    %c2_i32_0 = arith.constant 2 : i32
    %2 = arith.minsi %1, %c2_i32_0 : i32
    %c0_i32 = arith.constant 0 : i32
    %c0_i32_1 = arith.constant 0 : i32
    return %2, %c0_i32 : i32, i32
  }
  func.func @transform_1(%arg0: i32, %arg1: i32) -> (i32, i32) {
    %c2_i32 = arith.constant 2 : i32
    %0 = arith.muli %arg0, %c2_i32 : i32
    %1 = arith.addi %0, %arg1 : i32
    %c2_i32_0 = arith.constant 2 : i32
    %2 = arith.minsi %1, %c2_i32_0 : i32
    %c0_i32 = arith.constant 0 : i32
    %c0_i32_1 = arith.constant 0 : i32
    return %2, %c0_i32 : i32, i32
  }
  func.func @transform_2(%arg0: i32, %arg1: i32) -> (i32, i32, i32) {
    %c0_i32 = arith.constant 0 : i32
    %c0_i32_0 = arith.constant 0 : i32
    %c0_i32_1 = arith.constant 0 : i32
    return %arg0, %c0_i32, %c0_i32_0 : i32, i32, i32
  }
}

</mosaic_0001>

<bundles_post_ra>
// kernel: tpu_custom_call.1
= control target key start
LH: loop header
LB: loop body
LE: loop exit
PB: predicated region body
PF: predicated region fallthrough
CT: control target
= control target key end

     0   :  { %s489_s9 = smov 0   ;;  %s491_s10 = smov 0   ;;  %s564_s0 = inlined_call_operand.vmem [shape: f32[20,32], index: 0, kind: input, shape index: {}]   ;;  %s565_s1 = inlined_call_operand.vmem [shape: s32[20,1], index: 1, kind: input, shape index: {}]   ;;  %s566_s2 = inlined_call_operand.vmem [shape: f32[2,1,1], index: 2, kind: output, shape index: {}]  }
   0x1   :  { %s493_s11 = smov 0   ;;  %s495_s12 = smov 0  }
   0x2   :  { %s497_s13 = smov 0  }
   0x3 LB: > { %s21_s14 = sadd.s32 1, %s461_s11  ;;  %s24_s15 = sadd.s32 1, %s465_s12  ;;  %s469_s13 = sphi %s497_s13, %s12_s13   ;;  %s465_s12 = sphi %s495_s12, %s570_s12   ;;  %s461_s11 = sphi %s493_s11, %s569_s11   ;;  %s457_s10 = sphi %s491_s10, %s568_s10   ;;  %s453_s9 = sphi %s489_s9, %s567_s9  }
   0x4   : > { %p22_p0 = scmp.ge.s32.totalorder %s21_s14, 2  ;;  %p364_p1 = scmp.ge.s32.totalorder %s469_s13, 1 }
   0x5   : > { %p164_p2 = scmp.lt.s32.totalorder %s469_s13, 5 }
   0x6   : > { %s572_s14 = smov (%p22_p0, %s21_s14), 0  ;;  %s574_s15 = smov (!%p22_p0, %s24_s15), %s465_s12 }
   0x7   : > { %p165_p3 = pnand %p364_p1, %p164_p2  ;;  %p26_p4 = scmp.ge.s32.totalorder %s574_s15, 2 }
   0x8   : > { %s365_s16 = sshll.u32 (!%p165_p3), %s457_s10, 1  ;;  %p219_p5 = scmp.lt.s32.totalorder (!%p165_p3), %s457_s10, 1 }
   0x9   : > { %s576_s15 = smov (%p26_p4, %s574_s15), 0  ;;  %168 = sbr.rel (%p165_p3) target bundleno = 560 (0x230), region = 28 }
   0xa   : > { %s522_s17 = sadd.s32 (!%p165_p3), %s453_s9, %s365_s16  ;;  %p375_p7 = scmp.ne.s32.totalorder (!%p165_p3), %s453_s9, 0 }
   0xb   : > { %p197_p6 = scmp.lt.s32.totalorder (!%p165_p3), %s522_s17, 2 }
  0x10   : > { %s578_s10 = smov (!%p219_p5, %s457_s10), 1  ;;  %225 = sbr.rel (%p375_p7) target bundleno = 23 (0x17), region = 32 }
  0x11   : > { %s198_s18 = scalar_select %p197_p6, %s522_s17, 2 }
  0x12   : > { %s221_s21 = scalar_lea.vmem %s566_s2, %s578_s10  ;;  %vm226_vm0 = vcmask (!%p375_p7), 0   ;;  %v471_v0 = vmov (!%p375_p7), 0.0  }
  0x13   : > { %s580_s18 = smov (!%p197_p6, %s198_s18), 2  ;;  %227 = vst.msk [vmem:[#allocation2] sm:$0x1] (!%p375_p7), %vm226_vm0, %v471_v0 }
  0x14   : > { %s369_s22 = sshll.u32 %s580_s18, 3 }
  0x15   : > { %s202_s25 = scalar_lea.vmem %s564_s0, %s369_s22  ;;  %s214_s28 = scalar_lea.vmem %s565_s1, %s369_s22 }
  0x17 PF: > { %v228_v1 = vld [vmem:[%s202_s25] sm:$0xff]  ;;  %vm229_vm1 = vcmask 261120   ;;  %v472_v3 = vmov 0   ;;  %v242_v7 = vlaneseq  ;;  %v473_v11 = vmov -0.00015625   ;;  %s377_s29 = sshll.u32 %s522_s17, 3 }
  0x18   : > { %v230_v2 = vsel %vm229_vm1, %v228_v1, -inf  ;;  %426 = vset.pattern.permute.xlu0 %v472_v3  ;;  %v241_v4 = vld [vmem:[%s214_s28] sm:$0xff]  ;;  %v260_v19 = vstv %s377_s29  ;;  %vm265_vm4 = vcmask 7168   ;;  %vm278_vm5 = vcmask 0   ;;  %p378_p8 = scmp.ne.s32.totalorder %s453_s9, 1 }
  0x19   : > { %231 = vmax.xlane.f32.xlu0 %v230_v2  ;;  %v243_v9 = vand.u32 127, %v242_v7  ;;  %v258_v18 = vshrl.u32 %v242_v7, 7 }
  0x1a   : > { %v264_v35 = vld [vmem:[#allocation2] sm:$0x1] }
  0x1b   : > { %v261_v21 = vadd.s32 %v260_v19, %v258_v18 }
  0x1d   : > { %vm262_vm3 = vcmp.lt.s32.totalorder %v261_v21, 20 }
  0x2f   : > { %245 = vperm.xlu0 %426, %v241_v4  }
  0xa6   : > { %v232_v5 = vpop.xlane.xlu0 %231 }
  0xa7   : > { %v233_v6 = vsub.f32 %v228_v1, %v232_v5 }
  0xa9   : > { %v234_v8 = vmul.f32 1.442695, %v233_v6 }
  0xab   : > { %427 = vpow2.f32 %v234_v8 }
  0xae   : > { %v246_v10 = vpop.permute.xlu0 %245 }
  0xaf   : > { %vm247_vm2 = vcmp.eq.s32.totalorder %v243_v9, %v246_v10 }
  0xb0   : > { %v248_v12 = vsel %vm247_vm2, -0.04515625, %v473_v11 }
  0xb1   : > { %v249_v15 = vmul.f32 %v248_v12, %v233_v6 }
  0xb3   : > { %v250_v16 = vsel %vm229_vm1, %v249_v15, 0.0 }
  0xb5   : > { %v428_v13 = vpop.eup %427 }
  0xb6   : > { %v236_v14 = vsel %vm229_vm1, %v428_v13, 0.0 }
  0xb7   : > { %237 = vadd.xlane.f32.xlu1 %v236_v14 }
  0xbb   : > { %251 = vadd.xlane.f32.xlu1 %v250_v16 }
 0x144   : > { %v238_v17 = vpop.xlane.xlu1 %237 }
 0x145   : > { %429 = vlog2.f32 %v238_v17 }
 0x148   : > { %v252_v24 = vpop.xlane.xlu1 %251 }
 0x14f   : > { %v430_v20 = vpop.eup %429 }
 0x150   : > { %v240_v22 = vmul.f32 0.6931472, %v430_v20 }
 0x152   : > { %v253_v23 = vmul.f32 0.05, %v240_v22 }
 0x154   : > { %v254_v25 = vadd.f32 %v253_v23, %v252_v24 }
 0x156   : > { %v263_v26 = vsel %vm262_vm3, %v254_v25, 0.0 }
 0x157   : > { %v266_v27 = vsel %vm265_vm4, %v263_v26, 0.0 }
 0x158   : > { %267 = vadd.xlane.f32.xlu1 %v266_v27 }
 0x1e5   : > { %v268_v28 = vpop.xlane.xlu1 %267 }
 0x1e6   : > { %v269_v29 = vrot.slane %v268_v28, 4 }
 0x1e8   : > { %v270_v30 = vadd.f32 %v269_v29, %v268_v28 }
 0x1ea   : > { %v271_v31 = vrot.slane %v270_v30, 2 }
 0x1ec   : > { %v272_v32 = vadd.f32 %v271_v31, %v270_v30 }
 0x1ee   : > { %v273_v33 = vrot.slane %v272_v32, 1 }
 0x1f0   : > { %v274_v34 = vadd.f32 %v273_v33, %v272_v32 }
 0x1f2   : > { %381 = vpush %v274_v34 }
 0x221   : > { %283 = sbr.rel (%p378_p8) target bundleno = 560 (0x230), region = 36 }
 0x223   : > { %s382_s30 = spop %381 }
 0x224   : > { %v276_v36 = vstv %s382_s30 }
 0x225   : > { %v277_v37 = vadd.f32 %v276_v36, %v264_v35 }
 0x227   : > { %279 = vst.msk [vmem:[#allocation2] sm:$0x1] %vm278_vm5, %v277_v37 }
 0x22e   : > { %v284_v38 = vld [vmem:[#allocation2] sm:$0x1] }
 0x22f   : > { %285 = vst.msk [vmem:[%s221_s21] sm:$0x1] %vm278_vm5, %v284_v38 }
 0x230 PF: > { %s12_s13 = sadd.s32 1, %s469_s13   ;;  %s567_s9 = smov %s461_s11 }
 0x231   : > { %p9_p9 = scmp.ge.s32.totalorder %s12_s13, 6   ;;  %s568_s10 = smov %s465_s12 }
 0x232   : > { %s569_s11 = smov %s572_s14  ;;  %s570_s12 = smov %s576_s15 }
 0x233   :  { %11 = sbr.rel (!%p9_p9) target bundleno = 3 (0x3), region = 69 }

</bundles_post_ra>
